<compile_context>
chip_gen: v7x
topology: tpu7x:2x2x1
jax: 0.10.0
libtpu: 0.0.40
codegen_flags: <defaults>
</compile_context>

<pallas_src>
import functools

import numpy as np
import jax
import jax.numpy as jnp
from jax import lax
from jax.experimental import pallas as pl
from jax.experimental.pallas import tpu as pltpu


def _round_up(x, m):
    return ((x + m - 1) // m) * m


def _lane_roll(x, shift):
    """jnp.roll along the lane (last) axis with a static, non-negative shift."""
    n = x.shape[-1]
    return pltpu.roll(x, shift % n, axis=x.ndim - 1)


def attention_kernel(skip_ref, feat_ref, w1_ref, w4_ref, w3_ref, pcf_ref, pcs_ref,
                     out_ref, *, Cs, Cf, Csp, Cfp, L, mxu_dtype):
    f32 = jnp.float32
    md = mxu_dtype
    skip = skip_ref[...].astype(f32)          # (Cs, Mt) batch folded into lanes
    feat = feat_ref[...].astype(f32)          # (Cf, Mt) features on even lanes
    Mt = skip.shape[-1]

    # Per-batch lane position / parity (bit ops when L is a power of two).
    lane = lax.broadcasted_iota(jnp.int32, (1, Mt), 1)
    if L & (L - 1) == 0:
        pos = lane & (L - 1)
    else:
        pos = lane % L
    even = (lane & 1) == 0                    # per-batch parity == global (L even)

    # Resident f32 parameters (biases / 'same' conv taps).
    b1 = pcf_ref[:, 0:1]                      # (Cf, 1)
    b3 = pcf_ref[0:1, 1:2]                    # (1, 1)
    w2_0 = pcs_ref[:, 0:1]                    # (Cs, 1)
    w2_1 = pcs_ref[:, 1:2]
    w2_2 = pcs_ref[:, 2:3]
    b2 = pcs_ref[:, 3:4]
    b4 = pcs_ref[:, 4:5]

    # ---- conv_connection_features: Conv1d(Cs->Cf, k=3, stride=2, pad=1) ------
    # One MXU call for all 3 taps (tap groups padded to Cfp sublanes), then lane
    # rolls + a left-boundary mask.  Even lanes hold the true half-res outputs.
    P = jnp.dot(w1_ref[...], skip.astype(md), preferred_element_type=f32)  # (3Cfp, Mt)
    P0 = P[0 * Cfp:0 * Cfp + Cf, :]
    P1 = P[1 * Cfp:1 * Cfp + Cf, :]
    P2 = P[2 * Cfp:2 * Cfp + Cf, :]
    conv1 = (jnp.where(pos != 0, _lane_roll(P0, 1), 0.0)   # tap 0 -> skip[2j-1]
             + P1                                          # tap 1 -> skip[2j]
             + _lane_roll(P2, -1)                          # tap 2 -> skip[2j+1]
             + b1)

    # ---- add features, ReLU ---------------------------------------------------
    x = jnp.maximum(conv1 + feat, 0.0)

    # ---- conv_1x1: Conv1d(Cf->1, k=1) + sigmoid, on the (idle) MXU ------------
    G = jnp.dot(w3_ref[...], x.astype(md), preferred_element_type=f32)     # (8, Mt)
    g = jax.nn.sigmoid(G[0:1, :] + b3)                                     # (1, Mt)

    # ---- conv_features_connection: Conv1d(1->Cs, k=3, padding='same') ---------
    # Half-resolution neighbours live +-2 lanes away; pure VPU broadcast FMA.
    g_m = jnp.where(pos >= 2, _lane_roll(g, 2), 0.0)
    g_p = jnp.where(pos < L - 2, _lane_roll(g, -2), 0.0)
    y2 = w2_0 * g_m + w2_1 * g + w2_2 * g_p + b2                           # (Cs, Mt)

    # ---- resample: ConvTranspose1d(Cs->Cs, k=3, stride=2, pad=1, out_pad=1) ---
    # One stacked MXU call (tap groups padded to Csp=8-aligned sublanes), then
    # even/odd lane interleave via rolls + select.
    T = jnp.dot(w4_ref[...], y2.astype(md), preferred_element_type=f32)    # (3Csp, Mt)
    T0 = T[0 * Csp:0 * Csp + Cs, :]
    T1 = T[1 * Csp:1 * Csp + Cs, :]
    T2 = T[2 * Csp:2 * Csp + Cs, :]
    odd = _lane_roll(T2, 1) + jnp.where(pos != L - 1, _lane_roll(T0, -1), 0.0)
    up = jnp.where(even, T1, odd) + b4

    # ---- gate the skip connection --------------------------------------------
    out_ref[...] = (up * skip).astype(out_ref.dtype)


def _pick_batch_tile(B, L, *, lane_cap=8192, min_blocks=2):
    """Batches per lane block.

    Preference order: (a) >= min_blocks grid blocks AND block <= lane_cap
    (dual-TC sharding on v7x + DMA pipelining, large enough to amortize the
    ~0.35us/step overhead), (b) any block <= lane_cap, (c) smallest block.
    Blocks always cover whole batches so rolls never cross batch seams
    un-masked.  Returns None if no 128-lane-aligned batch tile exists.
    """
    cands = [bt for bt in range(1, B + 1) if B % bt == 0 and (bt * L) % 128 == 0]
    if not cands:
        return None

    def rank(bt):
        blk, nblk = bt * L, B // bt
        capped = blk <= lane_cap
        multi = nblk >= min_blocks
        return (multi and capped, capped, multi, blk if capped else -blk)

    return max(cands, key=rank)


def attention_forward(features, skip, params, *, mxu_dtype=jnp.float32):
    """features: (B, Cf, Lf) f32; skip: (B, Cs, L) f32 with L == 2*Lf."""
    W1, b1, W3, b3, W2, b2, W4, b4 = params
    B, Cf, Lf = features.shape
    _, Cs, L = skip.shape
    assert L == 2 * Lf, f"skip length {L} must be 2x features length {Lf}"

    f32 = jnp.float32
    Cfp = _round_up(Cf, 8)
    Csp = _round_up(Cs, 8)
    mxu_is_bf16 = np.dtype(mxu_dtype) == np.dtype(jnp.bfloat16)

    # ---- repack / consolidate weights host-side (hoisted out of the grid) ----
    # Stride-2 conv taps, stacked on sublanes, each tap group padded to Cfp rows.
    w1k = jnp.transpose(W1.astype(f32), (2, 0, 1))                       # (3, Cf, Cs)
    w1p = jnp.zeros((3, Cfp, Cs), f32).at[:, :Cf, :].set(w1k).reshape(3 * Cfp, Cs)
    # Transposed-conv taps (rows = out channel), each tap group padded to Csp.
    w4k = jnp.transpose(W4.astype(f32), (2, 1, 0))                       # (3, Cs, Cs)
    w4p = jnp.zeros((3, Csp, Cs), f32).at[:, :Cs, :].set(w4k).reshape(3 * Csp, Cs)
    # 1x1 conv weight as an 8-sublane-padded MXU LHS row.
    w3p = jnp.zeros((8, Cf), f32).at[0, :].set(W3.astype(f32)[0, :, 0])
    # Pre-cast MXU operands host-side (no per-step repack on resident weights).
    w1p = w1p.astype(mxu_dtype)
    w4p = w4p.astype(mxu_dtype)
    w3p = w3p.astype(mxu_dtype)
    # Small f32 parameter tables.
    pcf = (jnp.zeros((Cf, 2), f32)
           .at[:, 0].set(b1.astype(f32))
           .at[0, 1].set(b3.astype(f32)[0]))                             # (Cf, 2)
    pcs = jnp.concatenate([W2.astype(f32)[:, 0, :], b2.astype(f32)[:, None],
                           b4.astype(f32)[:, None]], axis=1)             # (Cs, 5)

    # ---- fold batch into the lane axis; zero-interleave features to length L --
    feat_io_dtype = jnp.bfloat16 if mxu_is_bf16 else f32   # cut feature DMA bytes
    skip_l = jnp.transpose(skip.astype(f32), (1, 0, 2)).reshape(Cs, B * L)
    feat_up = jnp.stack([features.astype(feat_io_dtype),
                         jnp.zeros(features.shape, feat_io_dtype)],
                        axis=-1).reshape(B, Cf, L)
    feat_l = jnp.transpose(feat_up, (1, 0, 2)).reshape(Cf, B * L)

    M = B * L
    bt = _pick_batch_tile(B, L)
    if bt is None:
        # Too few lanes for a 128-aligned batch tile: pad the lane axis once and
        # run a single lane-dense block (unmasked stores).  Per-batch masks in
        # the kernel neutralize roll wraps at the pad boundary / batch seams.
        Mp = _round_up(M, 128)
        skip_l = jnp.pad(skip_l, ((0, 0), (0, Mp - M)))
        feat_l = jnp.pad(feat_l, ((0, 0), (0, Mp - M)))
        blk, nblk = Mp, 1
    else:
        Mp = M
        blk, nblk = bt * L, B // bt

    # VMEM budget: ~0.6 KB/lane covers double-buffered I/O plus temporaries.
    bytes_per_lane = 4 * (2 * (2 * Cs + Cf)            # skip/feat/out, double-buffered
                          + 3 * Cfp + 3 * Csp + 8      # P, T, G matmul outputs
                          + 4 * Cf + 6 * Cs + 8)       # conv1/x/g/y2/up temporaries
    vmem_limit = int(max(32 * 1024 * 1024,
                         min(2 * blk * bytes_per_lane + (1 << 20), 64 * 1024 * 1024)))

    # Advisory cost so XLA overlaps the wrapper layout ops with the kernel.
    mm_flops = 2 * Cs * (3 * Cfp) + 2 * Cf * 8 + 2 * Cs * (3 * Csp)
    vpu_flops = 12 * Cf + 14 * Cs + 16
    cost = pl.CostEstimate(
        flops=int(Mp * (mm_flops + vpu_flops)),
        transcendentals=int(Mp),
        bytes_accessed=int(skip_l.size * 4 + feat_l.size * feat_l.dtype.itemsize
                           + Cs * Mp * 4
                           + (w1p.size + w4p.size + w3p.size) * w1p.dtype.itemsize
                           + (pcf.size + pcs.size) * 4))

    kernel = functools.partial(attention_kernel, Cs=Cs, Cf=Cf, Csp=Csp, Cfp=Cfp,
                               L=L, mxu_dtype=mxu_dtype)
    resident = lambda a: pl.BlockSpec(a.shape, lambda i: (0, 0))

    out_l = pl.pallas_call(
        kernel,
        out_shape=jax.ShapeDtypeStruct((Cs, Mp), f32),
        grid=(nblk,),
        in_specs=[
            pl.BlockSpec((Cs, blk), lambda i: (0, i)),   # skip (lane-tiled by batch)
            pl.BlockSpec((Cf, blk), lambda i: (0, i)),   # features (upsampled layout)
            resident(w1p), resident(w4p), resident(w3p),
            resident(pcf), resident(pcs),
        ],
        out_specs=pl.BlockSpec((Cs, blk), lambda i: (0, i)),
        compiler_params=pltpu.CompilerParams(
            dimension_semantics=("parallel",),
            vmem_limit_bytes=vmem_limit),
        cost_estimate=cost,
    )(skip_l, feat_l, w1p, w4p, w3p, pcf, pcs)

    # Un-fold: (Cs, B*L) -> (B, Cs, L)
    return jnp.transpose(out_l[:, :M].reshape(Cs, B, L), (1, 0, 2))


def attention_reference(features, skip, params):
    """Pure-JAX reference matching the PyTorch module semantics."""
    W1, b1, W3, b3, W2, b2, W4, b4 = params
    dn = ('NCH', 'OIH', 'NCH')
    t = lax.conv_general_dilated(skip, W1, (2,), [(1, 1)],
                                 dimension_numbers=dn) + b1[None, :, None]
    x = jax.nn.relu(t + features)
    g = lax.conv_general_dilated(x, W3, (1,), [(0, 0)],
                                 dimension_numbers=dn) + b3[None, :, None]
    g = jax.nn.sigmoid(g)
    y = lax.conv_general_dilated(g, W2, (1,), [(1, 1)],
                                 dimension_numbers=dn) + b2[None, :, None]
    # ConvTranspose1d(k=3, stride=2, padding=1, output_padding=1)
    Wt = jnp.flip(jnp.swapaxes(W4, 0, 1), axis=-1)
    z = lax.conv_general_dilated(y, Wt, (1,), [(1, 2)], lhs_dilation=(2,),
                                 dimension_numbers=dn) + b4[None, :, None]
    return z * skip


def _make_params(key, Cs, Cf):
    ks = jax.random.split(key, 8)
    W1 = jax.random.normal(ks[0], (Cf, Cs, 3), jnp.float32) * 0.2   # Conv1d(Cs->Cf,k=3,s=2,p=1)
    b1 = jax.random.normal(ks[1], (Cf,), jnp.float32) * 0.1
    W3 = jax.random.normal(ks[2], (1, Cf, 1), jnp.float32) * 0.2    # Conv1d(Cf->1,k=1)
    b3 = jax.random.normal(ks[3], (1,), jnp.float32) * 0.1
    W2 = jax.random.normal(ks[4], (Cs, 1, 3), jnp.float32) * 0.2    # Conv1d(1->Cs,k=3,same)
    b2 = jax.random.normal(ks[5], (Cs,), jnp.float32) * 0.1
    W4 = jax.random.normal(ks[6], (Cs, Cs, 3), jnp.float32) * 0.2   # ConvTranspose1d(Cs->Cs)
    b4 = jax.random.normal(ks[7], (Cs,), jnp.float32) * 0.1
    return (W1, b1, W3, b3, W2, b2, W4, b4)


if __name__ == "__main__":
    key = jax.random.PRNGKey(0)
    k_params, k_feat, k_skip, k_params2, k_feat2, k_skip2 = jax.random.split(key, 6)

    # ---- primary shapes: skip_connection_channels=4, features_channels=8, L=16
    B, Cs, Cf, L = 2, 4, 8, 16
    Lf = L // 2
    params = _make_params(k_params, Cs, Cf)
    features = jax.random.normal(k_feat, (B, Cf, Lf), jnp.float32)
    skip = jax.random.normal(k_skip, (B, Cs, L), jnp.float32)
    ref = attention_reference(features, skip, params)

    # Exact (f32 MXU operand) configuration.
    fwd_f32 = jax.jit(lambda f, s: attention_forward(f, s, params,
                                                     mxu_dtype=jnp.float32))
    out = jax.block_until_ready(fwd_f32(features, skip))
    assert out.shape == (B, Cs, L)
    assert jnp.allclose(out, ref, atol=1e-4, rtol=1e-4), \
        f"f32 max abs err {jnp.max(jnp.abs(out - ref))}"

    # v6e/v7x configuration: bf16 MXU operands + bf16 feature DMA, f32
    # accumulation / sigmoid / gating.
    fwd_bf16 = jax.jit(lambda f, s: attention_forward(f, s, params,
                                                      mxu_dtype=jnp.bfloat16))
    out_bf16 = jax.block_until_ready(fwd_bf16(features, skip))
    assert jnp.allclose(out_bf16, ref, atol=5e-2, rtol=5e-2), \
        f"bf16 max abs err {jnp.max(jnp.abs(out_bf16 - ref))}"

    # ---- secondary shapes exercising the multi-block (nblk >= 2) tiled path ----
    B2, L2 = 16, 64
    Lf2 = L2 // 2
    params2 = _make_params(k_params2, Cs, Cf)
    features2 = jax.random.normal(k_feat2, (B2, Cf, Lf2), jnp.float32)
    skip2 = jax.random.normal(k_skip2, (B2, Cs, L2), jnp.float32)
    ref2 = attention_reference(features2, skip2, params2)
    fwd2 = jax.jit(lambda f, s: attention_forward(f, s, params2,
                                                  mxu_dtype=jnp.float32))
    out2 = jax.block_until_ready(fwd2(features2, skip2))
    assert out2.shape == (B2, Cs, L2)
    assert jnp.allclose(out2, ref2, atol=1e-4, rtol=1e-4), \
        f"tiled f32 max abs err {jnp.max(jnp.abs(out2 - ref2))}"

    print("KERNEL_OK")
</pallas_src>

<mosaic_0001>
module attributes {stable_mosaic.version = 11 : i64} {
  func.func @attention_kernel(%arg0: i32, %arg1: memref<4x128xf32, #tpu.memory_space<vmem>>, %arg2: memref<8x128xf32, #tpu.memory_space<vmem>>, %arg3: memref<24x4xf32, #tpu.memory_space<vmem>>, %arg4: memref<24x4xf32, #tpu.memory_space<vmem>>, %arg5: memref<8x8xf32, #tpu.memory_space<vmem>>, %arg6: memref<8x2xf32, #tpu.memory_space<vmem>>, %arg7: memref<4x5xf32, #tpu.memory_space<vmem>>, %arg8: memref<4x128xf32, #tpu.memory_space<vmem>>) attributes {dimension_semantics = [#tpu.dimension_semantics<parallel>], iteration_bounds = array<i64: 1>, scalar_prefetch = 0 : i64, scratch_operands = 0 : i64, tpu.core_type = #tpu.core_type<tc>, window_params = [{transform_indices = @transform_0, window_bounds = array<i64: 4, 128>}, {transform_indices = @transform_1, window_bounds = array<i64: 8, 128>}, {pipeline_mode = #tpu.pipeline_mode<synchronous>, transform_indices = @transform_2, window_bounds = array<i64: 24, 4>}, {pipeline_mode = #tpu.pipeline_mode<synchronous>, transform_indices = @transform_3, window_bounds = array<i64: 24, 4>}, {pipeline_mode = #tpu.pipeline_mode<synchronous>, transform_indices = @transform_4, window_bounds = array<i64: 8, 8>}, {pipeline_mode = #tpu.pipeline_mode<synchronous>, transform_indices = @transform_5, window_bounds = array<i64: 8, 2>}, {pipeline_mode = #tpu.pipeline_mode<synchronous>, transform_indices = @transform_6, window_bounds = array<i64: 4, 5>}, {transform_indices = @transform_7, window_bounds = array<i64: 4, 128>}]} {
    %c0 = arith.constant 0 : index
    %c0_0 = arith.constant 0 : index
    %0 = vector.load %arg1[%c0, %c0_0] : memref<4x128xf32, #tpu.memory_space<vmem>>, vector<4x128xf32>
    %c0_1 = arith.constant 0 : index
    %c0_2 = arith.constant 0 : index
    %1 = vector.load %arg2[%c0_1, %c0_2] : memref<8x128xf32, #tpu.memory_space<vmem>>, vector<8x128xf32>
    %2 = tpu.iota {dimensions = array<i32: 1>} : vector<1x128xi32>
    %c15_i32 = arith.constant 15 : i32
    %3 = vector.broadcast %c15_i32 : i32 to vector<1x128xi32>
    %4 = arith.andi %2, %3 : vector<1x128xi32>
    %c1_i32 = arith.constant 1 : i32
    %5 = vector.broadcast %c1_i32 : i32 to vector<1x128xi32>
    %6 = arith.andi %2, %5 : vector<1x128xi32>
    %c0_i32 = arith.constant 0 : i32
    %7 = vector.broadcast %c0_i32 : i32 to vector<1x128xi32>
    %8 = arith.cmpi eq, %6, %7 : vector<1x128xi32>
    %c0_3 = arith.constant 0 : index
    %c0_4 = arith.constant 0 : index
    %9 = vector.load %arg6[%c0_3, %c0_4] : memref<8x2xf32, #tpu.memory_space<vmem>>, vector<8x1xf32>
    %c0_5 = arith.constant 0 : index
    %c1 = arith.constant 1 : index
    %10 = vector.load %arg6[%c0_5, %c1] : memref<8x2xf32, #tpu.memory_space<vmem>>, vector<1x1xf32>
    %c0_6 = arith.constant 0 : index
    %c0_7 = arith.constant 0 : index
    %11 = vector.load %arg7[%c0_6, %c0_7] : memref<4x5xf32, #tpu.memory_space<vmem>>, vector<4x1xf32>
    %c0_8 = arith.constant 0 : index
    %c1_9 = arith.constant 1 : index
    %12 = vector.load %arg7[%c0_8, %c1_9] : memref<4x5xf32, #tpu.memory_space<vmem>>, vector<4x1xf32>
    %c0_10 = arith.constant 0 : index
    %c2 = arith.constant 2 : index
    %13 = vector.load %arg7[%c0_10, %c2] : memref<4x5xf32, #tpu.memory_space<vmem>>, vector<4x1xf32>
    %c0_11 = arith.constant 0 : index
    %c3 = arith.constant 3 : index
    %14 = vector.load %arg7[%c0_11, %c3] : memref<4x5xf32, #tpu.memory_space<vmem>>, vector<4x1xf32>
    %c0_12 = arith.constant 0 : index
    %c4 = arith.constant 4 : index
    %15 = vector.load %arg7[%c0_12, %c4] : memref<4x5xf32, #tpu.memory_space<vmem>>, vector<4x1xf32>
    %c0_13 = arith.constant 0 : index
    %c0_14 = arith.constant 0 : index
    %16 = vector.load %arg3[%c0_13, %c0_14] : memref<24x4xf32, #tpu.memory_space<vmem>>, vector<24x4xf32>
    %cst = arith.constant dense<0.000000e+00> : vector<24x128xf32>
    %17 = tpu.matmul %16, %0, %cst {dimension_numbers = #tpu.dot_dimension_numbers<[1], [0], [0], [1], [0, 0, 1, 1], [], []>} : vector<24x4xf32>, vector<4x128xf32>, vector<24x128xf32> -> vector<24x128xf32>
    %18 = vector.extract_strided_slice %17 {offsets = [0, 0], sizes = [8, 128], strides = [1, 1]} : vector<24x128xf32> to vector<8x128xf32>
    %19 = vector.extract_strided_slice %17 {offsets = [8, 0], sizes = [8, 128], strides = [1, 1]} : vector<24x128xf32> to vector<8x128xf32>
    %20 = vector.extract_strided_slice %17 {offsets = [16, 0], sizes = [8, 128], strides = [1, 1]} : vector<24x128xf32> to vector<8x128xf32>
    %c0_i32_15 = arith.constant 0 : i32
    %21 = vector.broadcast %c0_i32_15 : i32 to vector<1x128xi32>
    %22 = arith.cmpi ne, %4, %21 : vector<1x128xi32>
    %c1_i32_16 = arith.constant 1 : i32
    %23 = tpu.dynamic_rotate %18 by %c1_i32_16 dim 1 : vector<8x128xf32>, i32 -> vector<8x128xf32>
    %cst_17 = arith.constant 0.000000e+00 : f32
    %24 = vector.shape_cast %22 : vector<1x128xi1> to vector<1x128xi1>
    %25 = vector.broadcast %24 : vector<1x128xi1> to vector<8x128xi1>
    %26 = vector.broadcast %cst_17 : f32 to vector<8x128xf32>
    %27 = arith.select %25, %23, %26 : vector<8x128xi1>, vector<8x128xf32>
    %28 = arith.addf %27, %19 : vector<8x128xf32>
    %c127_i32 = arith.constant 127 : i32
    %29 = tpu.dynamic_rotate %20 by %c127_i32 dim 1 : vector<8x128xf32>, i32 -> vector<8x128xf32>
    %30 = arith.addf %28, %29 : vector<8x128xf32>
    %31 = vector.broadcast %9 : vector<8x1xf32> to vector<8x128xf32>
    %32 = arith.addf %30, %31 : vector<8x128xf32>
    %33 = arith.addf %32, %1 : vector<8x128xf32>
    %cst_18 = arith.constant 0.000000e+00 : f32
    %34 = vector.broadcast %cst_18 : f32 to vector<8x128xf32>
    %35 = arith.maximumf %33, %34 : vector<8x128xf32>
    %c0_19 = arith.constant 0 : index
    %c0_20 = arith.constant 0 : index
    %36 = vector.load %arg5[%c0_19, %c0_20] : memref<8x8xf32, #tpu.memory_space<vmem>>, vector<8x8xf32>
    %cst_21 = arith.constant dense<0.000000e+00> : vector<8x128xf32>
    %37 = tpu.matmul %36, %35, %cst_21 {dimension_numbers = #tpu.dot_dimension_numbers<[1], [0], [0], [1], [0, 0, 1, 1], [], []>} : vector<8x8xf32>, vector<8x128xf32>, vector<8x128xf32> -> vector<8x128xf32>
    %38 = vector.extract_strided_slice %37 {offsets = [0, 0], sizes = [1, 128], strides = [1, 1]} : vector<8x128xf32> to vector<1x128xf32>
    %39 = vector.broadcast %10 : vector<1x1xf32> to vector<1x128xf32>
    %40 = arith.addf %38, %39 : vector<1x128xf32>
    %41 = arith.negf %40 : vector<1x128xf32>
    %42 = math.exp %41 : vector<1x128xf32>
    %cst_22 = arith.constant 1.000000e+00 : f32
    %43 = vector.broadcast %cst_22 : f32 to vector<1x128xf32>
    %44 = arith.addf %43, %42 : vector<1x128xf32>
    %45 = arith.divf %43, %44 : vector<1x128xf32>
    %c2_i32 = arith.constant 2 : i32
    %46 = vector.broadcast %c2_i32 : i32 to vector<1x128xi32>
    %47 = arith.cmpi sge, %4, %46 : vector<1x128xi32>
    %c2_i32_23 = arith.constant 2 : i32
    %48 = tpu.dynamic_rotate %45 by %c2_i32_23 dim 1 : vector<1x128xf32>, i32 -> vector<1x128xf32>
    %cst_24 = arith.constant 0.000000e+00 : f32
    %49 = vector.broadcast %cst_24 : f32 to vector<1x128xf32>
    %50 = arith.select %47, %48, %49 : vector<1x128xi1>, vector<1x128xf32>
    %c14_i32 = arith.constant 14 : i32
    %51 = vector.broadcast %c14_i32 : i32 to vector<1x128xi32>
    %52 = arith.cmpi slt, %4, %51 : vector<1x128xi32>
    %c126_i32 = arith.constant 126 : i32
    %53 = tpu.dynamic_rotate %45 by %c126_i32 dim 1 : vector<1x128xf32>, i32 -> vector<1x128xf32>
    %cst_25 = arith.constant 0.000000e+00 : f32
    %54 = vector.broadcast %cst_25 : f32 to vector<1x128xf32>
    %55 = arith.select %52, %53, %54 : vector<1x128xi1>, vector<1x128xf32>
    %56 = vector.broadcast %11 : vector<4x1xf32> to vector<4x128xf32>
    %57 = vector.broadcast %50 : vector<1x128xf32> to vector<4x128xf32>
    %58 = arith.mulf %56, %57 : vector<4x128xf32>
    %59 = vector.broadcast %12 : vector<4x1xf32> to vector<4x128xf32>
    %60 = vector.broadcast %45 : vector<1x128xf32> to vector<4x128xf32>
    %61 = arith.mulf %59, %60 : vector<4x128xf32>
    %62 = arith.addf %58, %61 : vector<4x128xf32>
    %63 = vector.broadcast %13 : vector<4x1xf32> to vector<4x128xf32>
    %64 = vector.broadcast %55 : vector<1x128xf32> to vector<4x128xf32>
    %65 = arith.mulf %63, %64 : vector<4x128xf32>
    %66 = arith.addf %62, %65 : vector<4x128xf32>
    %67 = vector.broadcast %14 : vector<4x1xf32> to vector<4x128xf32>
    %68 = arith.addf %66, %67 : vector<4x128xf32>
    %c0_26 = arith.constant 0 : index
    %c0_27 = arith.constant 0 : index
    %69 = vector.load %arg4[%c0_26, %c0_27] : memref<24x4xf32, #tpu.memory_space<vmem>>, vector<24x4xf32>
    %cst_28 = arith.constant dense<0.000000e+00> : vector<24x128xf32>
    %70 = tpu.matmul %69, %68, %cst_28 {dimension_numbers = #tpu.dot_dimension_numbers<[1], [0], [0], [1], [0, 0, 1, 1], [], []>} : vector<24x4xf32>, vector<4x128xf32>, vector<24x128xf32> -> vector<24x128xf32>
    %71 = vector.extract_strided_slice %70 {offsets = [0, 0], sizes = [4, 128], strides = [1, 1]} : vector<24x128xf32> to vector<4x128xf32>
    %72 = vector.extract_strided_slice %70 {offsets = [8, 0], sizes = [4, 128], strides = [1, 1]} : vector<24x128xf32> to vector<4x128xf32>
    %73 = vector.extract_strided_slice %70 {offsets = [16, 0], sizes = [4, 128], strides = [1, 1]} : vector<24x128xf32> to vector<4x128xf32>
    %c1_i32_29 = arith.constant 1 : i32
    %74 = tpu.dynamic_rotate %73 by %c1_i32_29 dim 1 : vector<4x128xf32>, i32 -> vector<4x128xf32>
    %c15_i32_30 = arith.constant 15 : i32
    %75 = vector.broadcast %c15_i32_30 : i32 to vector<1x128xi32>
    %76 = arith.cmpi ne, %4, %75 : vector<1x128xi32>
    %c127_i32_31 = arith.constant 127 : i32
    %77 = tpu.dynamic_rotate %71 by %c127_i32_31 dim 1 : vector<4x128xf32>, i32 -> vector<4x128xf32>
    %cst_32 = arith.constant 0.000000e+00 : f32
    %78 = vector.shape_cast %76 : vector<1x128xi1> to vector<1x128xi1>
    %79 = vector.broadcast %78 : vector<1x128xi1> to vector<4x128xi1>
    %80 = vector.broadcast %cst_32 : f32 to vector<4x128xf32>
    %81 = arith.select %79, %77, %80 : vector<4x128xi1>, vector<4x128xf32>
    %82 = arith.addf %74, %81 : vector<4x128xf32>
    %83 = vector.shape_cast %8 : vector<1x128xi1> to vector<1x128xi1>
    %84 = vector.broadcast %83 : vector<1x128xi1> to vector<4x128xi1>
    %85 = arith.select %84, %72, %82 : vector<4x128xi1>, vector<4x128xf32>
    %86 = vector.broadcast %15 : vector<4x1xf32> to vector<4x128xf32>
    %87 = arith.addf %85, %86 : vector<4x128xf32>
    %88 = arith.mulf %87, %0 : vector<4x128xf32>
    %c0_33 = arith.constant 0 : index
    %c0_34 = arith.constant 0 : index
    %89 = vector.load %arg8[%c0_33, %c0_34] : memref<4x128xf32, #tpu.memory_space<vmem>>, vector<4x128xf32>
    tpu.vector_store %arg8[%c0_33, %c0_34], %88 {strides = array<i32>} : memref<4x128xf32, #tpu.memory_space<vmem>>, vector<4x128xf32>,
    return
  }
  func.func @transform_0(%arg0: i32) -> (i32, i32) {
    %c0_i32 = arith.constant 0 : i32
    %c0_i32_0 = arith.constant 0 : i32
    return %c0_i32, %arg0 : i32, i32
  }
  func.func @transform_1(%arg0: i32) -> (i32, i32) {
    %c0_i32 = arith.constant 0 : i32
    %c0_i32_0 = arith.constant 0 : i32
    return %c0_i32, %arg0 : i32, i32
  }
  func.func @transform_2(%arg0: i32) -> (i32, i32) {
    %c0_i32 = arith.constant 0 : i32
    %c0_i32_0 = arith.constant 0 : i32
    %c0_i32_1 = arith.constant 0 : i32
    return %c0_i32, %c0_i32_0 : i32, i32
  }
  func.func @transform_3(%arg0: i32) -> (i32, i32) {
    %c0_i32 = arith.constant 0 : i32
    %c0_i32_0 = arith.constant 0 : i32
    %c0_i32_1 = arith.constant 0 : i32
    return %c0_i32, %c0_i32_0 : i32, i32
  }
  func.func @transform_4(%arg0: i32) -> (i32, i32) {
    %c0_i32 = arith.constant 0 : i32
    %c0_i32_0 = arith.constant 0 : i32
    %c0_i32_1 = arith.constant 0 : i32
    return %c0_i32, %c0_i32_0 : i32, i32
  }
  func.func @transform_5(%arg0: i32) -> (i32, i32) {
    %c0_i32 = arith.constant 0 : i32
    %c0_i32_0 = arith.constant 0 : i32
    %c0_i32_1 = arith.constant 0 : i32
    return %c0_i32, %c0_i32_0 : i32, i32
  }
  func.func @transform_6(%arg0: i32) -> (i32, i32) {
    %c0_i32 = arith.constant 0 : i32
    %c0_i32_0 = arith.constant 0 : i32
    %c0_i32_1 = arith.constant 0 : i32
    return %c0_i32, %c0_i32_0 : i32, i32
  }
  func.func @transform_7(%arg0: i32) -> (i32, i32) {
    %c0_i32 = arith.constant 0 : i32
    %c0_i32_0 = arith.constant 0 : i32
    return %c0_i32, %arg0 : i32, i32
  }
}

</mosaic_0001>

<bundles_post_ra>
// kernel: _lambda_.1
= control target key start
LH: loop header
LB: loop body
LE: loop exit
PB: predicated region body
PF: predicated region fallthrough
CT: control target
= control target key end

     0   :  { %vm49_vm0 = vcmask 1043456   ;;  %vm39_vm1 = vcmask 31744   ;;  %v467_v0 = vmov 0.0   ;;  %vm468_vm2 = vmmov 0   ;;  %s470_s10 = smov 1   ;;  %s472_s13 = smov 127   ;;  %s600_s0 = inlined_call_operand.vmem [shape: f32[4,128], index: 0, kind: input, shape index: {}]   ;;  %s601_s2 = inlined_call_operand.vmem [shape: f32[24,4], index: 2, kind: input, shape index: {}]   ;;  %s602_s5 = inlined_call_operand.vmem [shape: f32[8,2], index: 5, kind: input, shape index: {}]   ;;  %s603_s6 = inlined_call_operand.vmem [shape: f32[4,5], index: 6, kind: input, shape index: {}]   ;;  %s604_s1 = inlined_call_operand.vmem [shape: f32[8,128], index: 1, kind: input, shape index: {}]   ;;  %s605_s4 = inlined_call_operand.vmem [shape: f32[8,8], index: 4, kind: input, shape index: {}]   ;;  %s606_s3 = inlined_call_operand.vmem [shape: f32[24,4], index: 3, kind: input, shape index: {}]   ;;  %s607_s7 = inlined_call_operand.vmem [shape: f32[4,128], index: 7, kind: output, shape index: {}]  }
   0x1   :  { %419 = vmatprep.subr.mxu0 %v467_v0  ;;  %v522_v1 = vld [vmem:[%s600_s0] sm:$0xf]  ;;  %421 = vmatprep.mubr.msk.f32.mxu0 %vm468_vm2, %v467_v0  ;;  %v469_v3 = vmov 0   ;;  %v37_v5 = vld [vmem:[%s601_s2 + $0x8] sm:$0xff]  ;;  %v38_v6 = vld [vmem:[%s601_s2 + $0x10] sm:$0xff]  ;;  %v471_v12 = vmov 1   ;;  %v28_v16 = vlaneseq }
   0x2   :  { %v36_v2 = vld [vmem:[%s601_s2] sm:$0xff]  ;;  %420 = vmatpush3.msk.msra.mxu0 %vm49_vm0, %v522_v1  ;;  %457 = vset.pattern.permute.xlu0 %v469_v3  ;;  %vm152_vm4 = vcmask 64512   ;;  %v473_v30 = vmov 2   ;;  %v474_v31 = vmov 3   ;;  %v477_v40 = vmov 4   ;;  %v282_v61 = vld [vmem:[%s606_s3 + $0x8] sm:$0xff] }
   0x3   :  { %v33_v4 = vld [vmem:[%s602_s5] sm:$0xff]  ;;  %422 = vmatmul.mubr.msk.f32.vlgmr.msra.gmra.mrb[0].mxu0 %vm39_vm1, %v36_v2  ;;  %430 = vmatprep.subr.mxu1 %v467_v0  ;;  %v558_v17 = vand.u32 127, %v28_v16  ;;  %v252_v41 = vshrl.u32 %v28_v16, 7  ;;  %v283_v62 = vld [vmem:[%s606_s3 + $0x10] sm:$0xff] }
   0x4   :  { %145 = vperm.xlu0 %457, %v33_v4   ;;  %424 = vmatprep.mubr.msk.f32.mxu0 %vm468_vm2, %v467_v0  ;;  %v35_v9 = vld [vmem:[%s603_s6] sm:$0xf] }
   0x5   :  { %432 = vmatprep.mubr.msk.f32.mxu1 %vm468_vm2, %v467_v0  ;;  %458 = vset.pattern.permute.xlu1 %v471_v12  ;;  %v34_v15 = vld [vmem:[%s602_s5] sm:$0x1]  ;;  %v561_v19 = vand.u32 15, %v558_v17  ;;  %v253_v43 = vsub.s32 0, %v252_v41 }
   0x6   :  { %v27_v25 = vld [vmem:[%s604_s1] sm:$0xff]  ;;  %s475_s1 = smov 2  }
   0x7   :  { %425 = vmatmul.mubr.msk.f32.gmra.mrb[2].mxu0 %vm39_vm1, %v37_v5  ;;  %vm133_vm3 = vcmp.ne.s32.totalorder %v561_v19, 0  ;;  %v151_v29 = vld [vmem:[%s605_s4] sm:$0xff]  ;;  %s476_s4 = smov 126   ;;  %vm238_vm5 = vcmp.ge.s32.totalorder %v561_v19, 2  ;;  %vm242_vm6 = vcmp.lt.s32.totalorder %v561_v19, 14  ;;  %vm378_vm7 = vcmp.ne.s32.totalorder %v561_v19, 15 }
   0x8   :  { %427 = vmatprep.mubr.msk.f32.mxu0 %vm468_vm2, %v467_v0  ;;  %v281_v60 = vld [vmem:[%s606_s3] sm:$0xff] }
   0xb   :  { %428 = vmatmul.mubr.msk.f32.gmra.mrb[4].mxu0 %vm39_vm1, %v38_v6 }
  0x83   :  { %v146_v18 = vpop.permute.xlu0 %145 }
  0xd6   :  { %v119_v7 = vpop.f32.mrb[0].mxu0 }
  0xd7   :  { %134 = vrot.lane.b32.xlu0 %v119_v7, %s470_s10  ;;  %v423_v8 = vpop.f32.mrb[1].mxu0 }
  0xd8   :  { %v31_v8 = vand.u32 1, %v558_v17 }
  0xda   :  { %v124_v10 = vpop.f32.mrb[2].mxu0  ;;  %vm32_vm8 = vcmp.eq.s32.totalorder %v31_v8, 0 }
  0xdb   :  { %248 = vperm.xlu0 %457, %v35_v9   ;;  %v426_v11 = vpop.f32.mrb[3].mxu0 }
  0xde   :  { %v129_v13 = vpop.f32.mrb[4].mxu0 }
  0xdf   :  { %140 = vrot.lane.b32.xlu1 %v129_v13, %s472_s13  ;;  %v429_v14 = vpop.f32.mrb[5].mxu0  ;;  %459 = vset.pattern.permute.xlu0 %v473_v30 }
  0xe0   :  { %267 = vperm.xlu0 %459, %v35_v9  }
  0xe3   :  { %228 = vperm.xlu1 %458, %v34_v15  }
  0xe4   :  { %460 = vset.pattern.permute.xlu0 %v474_v31 }
  0xe5   :  { %277 = vperm.xlu0 %460, %v35_v9  }
  0xe7   :  { %257 = vperm.xlu1 %458, %v35_v9  }
  0xe9   :  { %462 = vset.pattern.permute.xlu0 %v477_v40 }
  0xeb   :  { %461 = vset.pattern.permute.xlu1 %v477_v40 }
 0x149   :  { %v135_v20 = vpop.permute.xlu0 %134 }
 0x14a   :  { %v138_v21 = vsel %vm133_vm3, %v135_v20, 0.0 }
 0x14b   :  { %v139_v22 = vadd.f32 %v138_v21, %v124_v10 }
 0x151   :  { %v141_v23 = vpop.permute.xlu1 %140 }
 0x152   :  { %v142_v24 = vadd.f32 %v141_v23, %v139_v22 }
 0x154   :  { %v148_v26 = vadd.f32 %v146_v18, %v142_v24 }
 0x156   :  { %v149_v27 = vadd.f32 %v148_v26, %v27_v25 }
 0x158   :  { %v150_v28 = vmax.f32 %v149_v27, 0.0 }
 0x15a   :  { %431 = vmatpush3.msra.mxu1 %v150_v28  ;;  %v249_v44 = vpop.permute.xlu0 %248 }
 0x15b   :  { %433 = vmatmul.mubr.msk.f32.vlgmr.msra.gmra.mrb[0].mxu1 %vm152_vm4, %v151_v29  ;;  %435 = vmatprep.subr.mxu1 %v467_v0 }
 0x15c   :  { %437 = vmatprep.mubr.msk.f32.mxu1 %vm468_vm2, %v467_v0 }
 0x15f   :  { %v268_v49 = vpop.permute.xlu0 %267 }
 0x162   :  { %v229_v32 = vpop.permute.xlu1 %228 }
 0x164   :  { %v278_v57 = vpop.permute.xlu0 %277 }
 0x166   :  { %v258_v42 = vpop.permute.xlu1 %257 }
 0x22e   :  { %v222_v33 = vpop.f32.mrb[0].mxu1 }
 0x22f   :  { %v231_v34 = vadd.f32 %v229_v32, %v222_v33  ;;  %v434_v35 = vpop.f32.mrb[1].mxu1 }
 0x231   :  { %v404_v36 = vmul.f32 -1.442695, %v231_v34 }
 0x233   :  { %463 = vpow2.f32 %v404_v36 }
 0x23d   :  { %v464_v37 = vpop.eup %463 }
 0x23e   :  { %v235_v38 = vadd.f32 1.0, %v464_v37 }
 0x240   :  { %465 = vrcp.f32 %v235_v38 }
 0x24a   :  { %v466_v39 = vpop.eup %465 }
 0x24b   :  { %239 = vrot.lane.b32.xlu1 %v466_v39, %s475_s1  ;;  %v263_v47 = vrot.slane %v466_v39, %v253_v43 }
 0x24d   :  { %v264_v53 = vmul.f32 %v263_v47, %v258_v42 }
 0x24f   :  { %243 = vrot.lane.b32.xlu1 %v466_v39, %s476_s4 }
 0x253   :  { %389 = vperm.xlu1 %461, %v35_v9  }
 0x2bd   :  { %v240_v45 = vpop.permute.xlu1 %239 }
 0x2be   :  { %v241_v46 = vsel %vm238_vm5, %v240_v45, 0.0 }
 0x2bf   :  { %v254_v48 = vrot.slane %v241_v46, %v253_v43 }
 0x2c1   :  { %v255_v50 = vmul.f32 %v254_v48, %v249_v44  ;;  %v244_v51 = vpop.permute.xlu1 %243 }
 0x2c2   :  { %v245_v52 = vsel %vm242_vm6, %v244_v51, 0.0 }
 0x2c3   :  { %v273_v54 = vrot.slane %v245_v52, %v253_v43  ;;  %v265_v56 = vadd.f32 %v264_v53, %v255_v50 }
 0x2c5   :  { %v274_v55 = vmul.f32 %v273_v54, %v268_v49 }
 0x2c7   :  { %v275_v58 = vadd.f32 %v274_v55, %v265_v56 }
 0x2c9   :  { %v280_v59 = vadd.f32 %v278_v57, %v275_v58 }
 0x2cb   :  { %436 = vmatpush3.msk.msra.mxu1 %vm49_vm0, %v280_v59 }
 0x2cc   :  { %438 = vmatmul.mubr.msk.f32.vlgmr.msra.gmra.mrb[2].mxu1 %vm39_vm1, %v281_v60 }
 0x2cd   :  { %440 = vmatprep.mubr.msk.f32.mxu1 %vm468_vm2, %v467_v0 }
 0x2d0   :  { %441 = vmatmul.mubr.msk.f32.gmra.mrb[4].mxu1 %vm39_vm1, %v282_v61 }
 0x2d1   :  { %443 = vmatprep.mubr.msk.f32.mxu1 %vm468_vm2, %v467_v0 }
 0x2d2   :  { %v390_v7 = vpop.permute.xlu1 %389 }
 0x2d4   :  { %444 = vmatmul.mubr.msk.f32.gmra.mrb[6].mxu1 %vm39_vm1, %v283_v62 }
 0x39f   :  { %v362_v63 = vpop.f32.mrb[2].mxu1 }
 0x3a0   :  { %v439_v2 = vpop.f32.mrb[3].mxu1  ;;  %379 = vrot.lane.b32.xlu1 %v362_v63, %s472_s13 }
 0x3a3   :  { %v367_v3 = vpop.f32.mrb[4].mxu1 }
 0x3a4   :  { %v442_v4 = vpop.f32.mrb[5].mxu1 }
 0x3a7   :  { %v372_v5 = vpop.f32.mrb[6].mxu1 }
 0x3a8   :  { %376 = vrot.lane.b32.xlu0 %v372_v5, %s470_s10  ;;  %v445_v6 = vpop.f32.mrb[7].mxu1 }
 0x412   :  { %v380_v0 = vpop.permute.xlu1 %379 }
 0x413   :  { %v383_v9 = vsel %vm378_vm7, %v380_v0, 0.0 }
 0x41a   :  { %v377_v10 = vpop.permute.xlu0 %376 }
 0x41b   :  { %v384_v11 = vadd.f32 %v383_v9, %v377_v10 }
 0x41d   :  { %v387_v12 = vsel %vm32_vm8, %v367_v3, %v384_v11 }
 0x41e   :  { %v392_v13 = vadd.f32 %v390_v7, %v387_v12 }
 0x420   :  { %v393_v14 = vmul.f32 %v392_v13, %v522_v1 }
 0x422   :  { %394 = vst [vmem:[%s607_s7] sm:$0xf] %v393_v14 }

</bundles_post_ra>
